<compile_context>
chip_gen: v6e
topology: v6e:2x2x1
jax: 0.10.0
libtpu: 0.0.40
codegen_flags: <defaults>
</compile_context>

<pallas_src>
import jax
import jax.numpy as jnp
from jax import lax
from jax.experimental import pallas as pl
from jax.experimental.pallas import tpu as pltpu

EPS = 1e-12  # F.normalize default eps


def _pool_normalize_kernel(x_ref, p_ref, o_ref):
    # x_ref: (nb, C, HW)  raw NCHW block, flattened spatial on the lane axis
    # p_ref: (HW, Op)     pooling matrix (Op = Ho*Wo)
    # o_ref: (nb, C, Op)
    nb, C, HW = x_ref.shape
    Op = p_ref.shape[1]
    p = p_ref[...]

    def _l2_normalize(pooled):
        # pooled: (..., C, Op) f32; L2-normalize over the channel axis.
        sumsq = jnp.sum(pooled * pooled, axis=-2, keepdims=True)
        norm = jnp.maximum(jnp.sqrt(sumsq), EPS)  # matches max(||h||, eps)
        return pooled / norm

    if C % 8 == 0:
        # Fold the whole block into one large-M MXU matmul (the reshape is
        # layout-free when C is a sublane multiple).
        pooled = jnp.dot(
            x_ref[...].reshape(nb * C, HW), p,
            preferred_element_type=jnp.float32,
        ).reshape(nb, C, Op)
        o_ref[...] = _l2_normalize(pooled).astype(o_ref.dtype)
    else:
        # C not a multiple of 8: a (nb, C, HW) -> (nb*C, HW) reshape would
        # force a sublane relayout, so issue per-batch matmuls instead.
        def body(b, carry):
            pooled = jnp.dot(x_ref[b], p, preferred_element_type=jnp.float32)
            o_ref[b] = _l2_normalize(pooled).astype(o_ref.dtype)
            return carry

        lax.fori_loop(0, nb, body, 0, unroll=True if nb <= 8 else 8)


def _make_pool_matrix(H, W, k, dtype=jnp.float32):
    """(H*W, Ho*Wo) matrix P with P[h*W+w, ho*Wo+wo] = 1/k^2 iff input pixel
    (h, w) falls inside output window (ho, wo) of a k x k / stride-k average
    pool (floor semantics: partial windows dropped)."""
    Ho, Wo = H // k, W // k
    h_idx = jnp.arange(H * W) // W
    w_idx = jnp.arange(H * W) % W
    ho_idx = jnp.arange(Ho * Wo) // Wo
    wo_idx = jnp.arange(Ho * Wo) % Wo
    in_h = (h_idx[:, None] // k) == ho_idx[None, :]
    in_w = (w_idx[:, None] // k) == wo_idx[None, :]
    in_range = (h_idx[:, None] < Ho * k) & (w_idx[:, None] < Wo * k)
    mask = in_h & in_w & in_range
    return (mask.astype(jnp.float32) / float(k * k)).astype(dtype)


def finetune_cnn_forward(x):
    """x: (N, C, H, W) NCHW.  Returns (N, C, H//7, W//7)."""
    N, C, H, W = x.shape
    k = 7
    Ho, Wo = H // k, W // k
    Op = Ho * Wo
    HW = H * W

    # Free reshape (NCHW is already contiguous as (N, C, HW)); no transpose,
    # no sublane/lane padding -> no extra HBM traffic before the kernel.
    x_flat = x.reshape(N, C, HW)

    # If the upstream backbone emits bf16, keep activations bf16 through the
    # DMA and MXU (accumulation is f32 via preferred_element_type).
    pool_dtype = x.dtype if x.dtype == jnp.bfloat16 else jnp.float32
    pool = _make_pool_matrix(H, W, k, dtype=pool_dtype)

    # Batch blocking: target ~8 MiB contiguous input DMAs per grid step
    # (double-buffered by Pallas), but keep >= 2 grid steps when N >= 2 so both
    # v7x TensorCores get work under dimension_semantics=("parallel",).
    # (On single-TC v5e/v6e the extra step only costs ~0.35 us.)
    bytes_per_batch = C * HW * x.dtype.itemsize
    target_block_bytes = 8 << 20
    nb = max(1, min(N, target_block_bytes // max(1, bytes_per_batch)))
    if N >= 2:
        nb = min(nb, pl.cdiv(N, 2))
    n_steps = pl.cdiv(N, nb)

    # VMEM budget: 2 pipeline buffers per operand + margin.  Fits the v7x
    # 64 MiB physical budget and overrides the v5e 16 MiB scoped default when
    # blocks are large.
    x_blk = nb * bytes_per_batch
    o_blk = nb * C * Op * x.dtype.itemsize
    p_blk = HW * Op * pool.dtype.itemsize
    vmem_limit = int(min(max(2 * (x_blk + o_blk + p_blk) + (4 << 20), 16 << 20),
                         48 << 20))

    cost = pl.CostEstimate(
        flops=2 * N * C * HW * Op,
        transcendentals=N * Op,
        bytes_accessed=(N * C * HW + HW * Op + N * C * Op) * x.dtype.itemsize,
    )

    out = pl.pallas_call(
        _pool_normalize_kernel,
        out_shape=jax.ShapeDtypeStruct((N, C, Op), x.dtype),
        grid_spec=pltpu.PrefetchScalarGridSpec(
            num_scalar_prefetch=0,
            grid=(n_steps,),
            in_specs=[
                # Full C / HW dims per block -> exempt from the (8, 128) rule;
                # each block is one contiguous HBM slab.
                pl.BlockSpec((nb, C, HW), lambda n: (n, 0, 0)),
                pl.BlockSpec((HW, Op), lambda n: (0, 0)),
            ],
            out_specs=pl.BlockSpec((nb, C, Op), lambda n: (n, 0, 0)),
        ),
        compiler_params=pltpu.CompilerParams(
            dimension_semantics=("parallel",),
            vmem_limit_bytes=vmem_limit,
        ),
        cost_estimate=cost,
    )(x_flat, pool)

    # Free reshape: (N, C, Op) -> (N, C, Ho, Wo); no transpose needed.
    return out.reshape(N, C, Ho, Wo)


def _reference(x):
    N, C, H, W = x.shape
    k = 7
    Ho, Wo = H // k, W // k
    h = x[:, :, :Ho * k, :Wo * k].reshape(N, C, Ho, k, Wo, k).mean(axis=(3, 5))
    norm = jnp.sqrt(jnp.sum(h * h, axis=1, keepdims=True))
    return h / jnp.maximum(norm, EPS)


if __name__ == "__main__":
    key = jax.random.PRNGKey(0)
    # Small NCHW input; 16x16 spatial exercises avg_pool2d's floor semantics
    # (only the top-left 14x14 region contributes to the 2x2 pooled output).
    x = jax.random.normal(key, (2, 4, 16, 16), dtype=jnp.float32)

    out = jax.block_until_ready(finetune_cnn_forward(x))

    ref = _reference(x)
    assert out.shape == (2, 4, 2, 2), out.shape
    assert jnp.allclose(out, ref, atol=1e-5, rtol=1e-5), "mismatch vs reference"

    print("KERNEL_OK")
</pallas_src>

<mosaic_0001>
module attributes {stable_mosaic.version = 11 : i64} {
  func.func @_pool_normalize_kernel(%arg0: i32, %arg1: memref<1x4x256xf32, #tpu.memory_space<vmem>>, %arg2: memref<256x4xf32, #tpu.memory_space<vmem>>, %arg3: memref<1x4x4xf32, #tpu.memory_space<vmem>>) attributes {dimension_semantics = [#tpu.dimension_semantics<parallel>], iteration_bounds = array<i64: 2>, scalar_prefetch = 0 : i64, scratch_operands = 0 : i64, tpu.core_type = #tpu.core_type<tc>, window_params = [{transform_indices = @transform_0, window_bounds = array<i64: 1, 4, 256>}, {pipeline_mode = #tpu.pipeline_mode<synchronous>, transform_indices = @transform_1, window_bounds = array<i64: 256, 4>}, {transform_indices = @transform_2, window_bounds = array<i64: 1, 4, 4>}]} {
    %c0 = arith.constant 0 : index
    %c0_0 = arith.constant 0 : index
    %0 = vector.load %arg2[%c0, %c0_0] : memref<256x4xf32, #tpu.memory_space<vmem>>, vector<256x4xf32>
    %c0_i32 = arith.constant 0 : i32
    %1 = arith.index_cast %c0_i32 : i32 to index
    %c0_1 = arith.constant 0 : index
    %c0_2 = arith.constant 0 : index
    %2 = vector.load %arg1[%1, %c0_1, %c0_2] : memref<1x4x256xf32, #tpu.memory_space<vmem>>, vector<1x4x256xf32>
    %3 = vector.shape_cast %2 : vector<1x4x256xf32> to vector<4x256xf32>
    %cst = arith.constant dense<0.000000e+00> : vector<4x4xf32>
    %4 = tpu.matmul %3, %0, %cst {dimension_numbers = #tpu.dot_dimension_numbers<[1], [0], [0], [1], [0, 0, 1, 1], [], []>} : vector<4x256xf32>, vector<256x4xf32>, vector<4x4xf32> -> vector<4x4xf32>
    %5 = arith.mulf %4, %4 : vector<4x4xf32>
    %cst_3 = arith.constant dense<0.000000e+00> : vector<4xf32>
    %6 = vector.multi_reduction <add>, %5, %cst_3 [0] : vector<4x4xf32> to vector<4xf32>
    %7 = vector.shape_cast %6 : vector<4xf32> to vector<1x4xf32>
    %8 = math.sqrt %7 : vector<1x4xf32>
    %cst_4 = arith.constant 9.99999996E-13 : f32
    %9 = vector.broadcast %cst_4 : f32 to vector<1x4xf32>
    %10 = arith.maximumf %8, %9 : vector<1x4xf32>
    %11 = vector.broadcast %10 : vector<1x4xf32> to vector<4x4xf32>
    %12 = arith.divf %4, %11 : vector<4x4xf32>
    %13 = arith.index_cast %c0_i32 : i32 to index
    %c0_5 = arith.constant 0 : index
    %c0_6 = arith.constant 0 : index
    %14 = vector.load %arg3[%13, %c0_5, %c0_6] : memref<1x4x4xf32, #tpu.memory_space<vmem>>, vector<1x4x4xf32>
    %15 = vector.shape_cast %14 : vector<1x4x4xf32> to vector<4x4xf32>
    %16 = vector.shape_cast %12 : vector<4x4xf32> to vector<1x4x4xf32>
    tpu.vector_store %arg3[%13, %c0_5, %c0_6], %16 {strides = array<i32>} : memref<1x4x4xf32, #tpu.memory_space<vmem>>, vector<1x4x4xf32>,
    %c1_i32 = arith.constant 1 : i32
    return
  }
  func.func @transform_0(%arg0: i32) -> (i32, i32, i32) {
    %c0_i32 = arith.constant 0 : i32
    %c0_i32_0 = arith.constant 0 : i32
    %c0_i32_1 = arith.constant 0 : i32
    return %arg0, %c0_i32, %c0_i32_0 : i32, i32, i32
  }
  func.func @transform_1(%arg0: i32) -> (i32, i32) {
    %c0_i32 = arith.constant 0 : i32
    %c0_i32_0 = arith.constant 0 : i32
    %c0_i32_1 = arith.constant 0 : i32
    return %c0_i32, %c0_i32_0 : i32, i32
  }
  func.func @transform_2(%arg0: i32) -> (i32, i32, i32) {
    %c0_i32 = arith.constant 0 : i32
    %c0_i32_0 = arith.constant 0 : i32
    %c0_i32_1 = arith.constant 0 : i32
    return %arg0, %c0_i32, %c0_i32_0 : i32, i32, i32
  }
}

</mosaic_0001>

<bundles_post_ra>
// kernel: tpu_custom_call.1
= control target key start
LH: loop header
LB: loop body
LE: loop exit
PB: predicated region body
PF: predicated region fallthrough
CT: control target
= control target key end

     0   :  { %7 = vsyncpa [#allocation3], 0  ;;  %s695_s0 = inlined_call_operand.vmem [shape: f32[2,4,256], index: 0, kind: input, shape index: {}]   ;;  %s696_s1 = inlined_call_operand.vmem [shape: f32[256,4], index: 1, kind: input, shape index: {}]   ;;  %s697_s2 = inlined_call_operand.hbm [shape: f32[2,4,4], index: 2, kind: output, shape index: {}]  }
   0x1   :  { %9 = vsyncpa [#allocation3 + $0x1], 0  ;;  %s510_s9 = smov 0   ;;  %s512_s10 = smov 0  }
   0x2   :  { %s514_s11 = smov 0   ;;  %s516_s12 = smov 0  }
   0x3 LB: > { %s531_s13 = sadd.s32 4294967295, %s492_s12   ;;  %s341_s14 = sadd.s32 4294967294, %s492_s12   ;;  %s492_s12 = sphi %s516_s12, %s703_s12   ;;  %s488_s11 = sphi %s514_s11, %s702_s11   ;;  %s484_s10 = sphi %s512_s10, %s701_s10   ;;  %s480_s9 = sphi %s510_s9, %s700_s9  }
   0x4   : > { %s535_s15 = sadd.s32 1, %s492_s12   ;;  %s69_s16 = sadd.s32 1, %s488_s11 }
   0x5   : > { %s66_s17 = ssub.s32 %s492_s12, %s535_s15  ;;  %p79_p0 = scmp.ne.s32.totalorder %s488_s11, %s484_s10 }
   0x6   : > { %p67_p1 = scmp.eq.s32.totalorder %s66_s17, 0  ;;  %p80_p2 = scmp.eq.s32.totalorder %s531_s13, 1 }
   0x7   : > { %p85_p3 = scmp.ne.s32.totalorder %s484_s10, %s480_s9  ;;  %p86_p4 = scmp.eq.s32.totalorder %s341_s14, 1 }
   0x8   : > { %s546_s18 = scalar_select %p67_p1, %s488_s11, %s69_s16  }
   0x9   : > { %p548_p5 = por %p80_p2, %p79_p0  ;;  %p552_p6 = por %p86_p4, %p85_p3 }
   0xa   : > { %p344_p7 = scmp.ge.s32.totalorder %s492_s12, 1  ;;  %p115_p8 = scmp.lt.s32.totalorder %s492_s12, 3 }
   0xc   : > { %p116_p9 = pnand %p344_p7, %p115_p8 }
   0xd   : > { %p137_p10 = scmp.lt.s32.totalorder (!%p116_p9), %s531_s13, 1  ;;  %s134_s5 = sand.u32 (!%p116_p9), 1, %s484_s10  }
   0xe   : > { %119 = sbr.rel (%p116_p9) target bundleno = 313 (0x139), region = 28  ;;  %s345_s6 = sshll.u32 (!%p116_p9), %s134_s5, 2 }
   0xf   : > { %s349_s7 = sshll.u32 (!%p116_p9), %s531_s13, 6  ;;  %s269_s22 = scalar_lea.sflag (!%p116_p9), [#allocation3], %s134_s5 }
  0x10   : > { %s280_s21 = scalar_lea.hbm (!%p116_p9), %s697_s2, %s349_s7  ;;  %s494_s24 = smov (!%p116_p9), [#allocation2]  }
  0x11   : > { %s436_s25 = sshll.u32 (!%p116_p9), %s494_s24, 4  ;;  %s437_s25 = int_to_ptr.vmem [resolvable:$false] %s436_s25 }
  0x13   : > { %v173_v0 = vld [vmem:[%s696_s1 + $0xf8] sm:$0xff]  ;;  %v172_v2 = vld [vmem:[%s696_s1 + $0xf0] sm:$0xff]  ;;  %v171_v4 = vld [vmem:[%s696_s1 + $0xe8] sm:$0xff]  ;;  %s138_s3 = scalar_select %p137_p10, %s531_s13, 1  ;;  %vm249_vm0 = vcmask 27648  }
  0x14   : > { %v157_v1 = vld [vmem:[%s696_s1 + $0x78] sm:$0xff]  ;;  %353 = vmatprep.subr.mxu0 %v173_v0  ;;  %v156_v3 = vld [vmem:[%s696_s1 + $0x70] sm:$0xff]  ;;  %v155_v5 = vld [vmem:[%s696_s1 + $0x68] sm:$0xff]  ;;  %s438_s13 = scalar_lea.vmem %s437_s25, 128 }
  0x15   : > { %354 = vmatpush3.msra.mxu0 %v157_v1  ;;  %v170_v6 = vld [vmem:[%s696_s1 + $0xe0] sm:$0xff]  ;;  %s352_s8 = sshll.u32 %s138_s3, 3  ;;  %v169_v8 = vld [vmem:[%s696_s1 + $0xd8] sm:$0xff]  ;;  %v168_v10 = vld [vmem:[%s696_s1 + $0xd0] sm:$0xff] }
  0x16   : > { %355 = vmatprep.subr.mxu0 %v172_v2  ;;  %v154_v7 = vld [vmem:[%s696_s1 + $0x60] sm:$0xff]  ;;  %v153_v9 = vld [vmem:[%s696_s1 + $0x58] sm:$0xff]  ;;  %s141_s26 = scalar_lea.vmem %s695_s0, %s352_s8  ;;  %v152_v11 = vld [vmem:[%s696_s1 + $0x50] sm:$0xff]  ;;  %s136_s8 = scalar_lea.vmem [#allocation2], %s345_s6 }
  0x17   : > { %356 = vmatpush3.msra.mxu0 %v156_v3  ;;  %v167_v12 = vld [vmem:[%s696_s1 + $0xc8] sm:$0xff]  ;;  %v174_v13 = vld [vmem:[%s141_s26] sm:$0xff]  ;;  %v165_v18 = vld [vmem:[%s696_s1 + $0xb8] sm:$0xff]  ;;  %s282_s14 = sshll.u32 %s136_s8, 4  ;;  %s283_s14 = int_to_ptr.vmem [resolvable:$true] %s282_s14 }
  0x18   : > { %357 = vmatprep.subr.mxu0 %v171_v4  ;;  %v151_v14 = vld [vmem:[%s696_s1 + $0x48] sm:$0xff]  ;;  %v176_v15 = vcombine.high %v174_v13, %v174_v13  ;;  %v166_v16 = vld [vmem:[%s696_s1 + $0xc0] sm:$0xff]  ;;  %v149_v19 = vld [vmem:[%s696_s1 + $0x38] sm:$0xff]  ;;  %s432_s23 = scalar_lea.vmem %s283_s14, 64  ;;  %p439_p0 = scmp.lt.s32.totalorder %s283_s14, %s437_s25 }
  0x19   : > { %358 = vmatpush3.msra.mxu0 %v155_v5  ;;  %v150_v17 = vld [vmem:[%s696_s1 + $0x40] sm:$0xff]  ;;  %v164_v20 = vld [vmem:[%s696_s1 + $0xb0] sm:$0xff]  ;;  %v163_v22 = vld [vmem:[%s696_s1 + $0xa8] sm:$0xff]  ;;  %p433_p11 = scmp.ne.s32.totalorder %s283_s14, %s432_s23  ;;  %p440_p1 = scmp.lt.s32.totalorder %s438_s13, %s432_s23 }
  0x1a   : > { %359 = vmatprep.subr.mxu0 %v170_v6  ;;  %242 = vmatprep.mubr.f32.mxu0 %v176_v15  ;;  %v148_v21 = vld [vmem:[%s696_s1 + $0x30] sm:$0xff]  ;;  %v147_v23 = vld [vmem:[%s696_s1 + $0x28] sm:$0xff]  ;;  %v162_v24 = vld [vmem:[%s696_s1 + $0xa0] sm:$0xff] }
  0x1b   : > { %360 = vmatpush3.msra.mxu0 %v154_v7  ;;  %v146_v25 = vld [vmem:[%s696_s1 + $0x20] sm:$0xff]  ;;  %v161_v26 = vld [vmem:[%s696_s1 + $0x98] sm:$0xff]  ;;  %v160_v28 = vld [vmem:[%s696_s1 + $0x90] sm:$0xff]  ;;  %p434_p12 = pnand %p433_p11, %p548_p5  ;;  %p441_p2 = por %p440_p1, %p439_p0 }
  0x1c   : > { %361 = vmatprep.subr.mxu0 %v169_v8  ;;  %v145_v27 = vld [vmem:[%s696_s1 + $0x18] sm:$0xff]  ;;  %v144_v29 = vld [vmem:[%s696_s1 + $0x10] sm:$0xff]  ;;  %v159_v30 = vld [vmem:[%s696_s1 + $0x88] sm:$0xff] }
  0x1d   : > { %362 = vmatpush3.msra.mxu0 %v153_v9  ;;  %v143_v31 = vld [vmem:[%s696_s1 + $0x8] sm:$0xff]  ;;  %v158_v32 = vld [vmem:[%s696_s1 + $0x80] sm:$0xff]  ;;  %p435_p13 = pneg %p434_p12 }
  0x1e   : > { %363 = vmatprep.subr.mxu0 %v168_v10  ;;  %v142_v33 = vld [vmem:[%s696_s1] sm:$0xff] }
  0x1f   : > { %364 = vmatpush3.msra.mxu0 %v152_v11  ;;  %p442_p3 = pnand %p441_p2, %p435_p13 }
  0x20   : > { %365 = vmatprep.subr.mxu0 %v167_v12 }
  0x21   : > { %366 = vmatpush3.msra.mxu0 %v151_v14 }
  0x22   : > { %367 = vmatprep.subr.mxu0 %v166_v16 }
  0x23   : > { %368 = vmatpush3.msra.mxu0 %v150_v17 }
  0x24   : > { %369 = vmatprep.subr.mxu0 %v165_v18 }
  0x25   : > { %370 = vmatpush3.msra.mxu0 %v149_v19 }
  0x26   : > { %371 = vmatprep.subr.mxu0 %v164_v20 }
  0x27   : > { %372 = vmatpush3.msra.mxu0 %v148_v21 }
  0x28   : > { %373 = vmatprep.subr.mxu0 %v163_v22 }
  0x29   : > { %374 = vmatpush3.msra.mxu0 %v147_v23 }
  0x2a   : > { %375 = vmatprep.subr.mxu0 %v162_v24 }
  0x2b   : > { %376 = vmatpush3.msra.mxu0 %v146_v25 }
  0x2c   : > { %377 = vmatprep.subr.mxu0 %v161_v26 }
  0x2d   : > { %378 = vmatpush3.msra.mxu0 %v145_v27 }
  0x2e   : > { %379 = vmatprep.subr.mxu0 %v160_v28 }
  0x2f   : > { %380 = vmatpush3.msra.mxu0 %v144_v29 }
  0x30   : > { %381 = vmatprep.subr.mxu0 %v159_v30 }
  0x31   : > { %382 = vmatpush3.msra.mxu0 %v143_v31 }
  0x32   : > { %383 = vmatprep.subr.mxu0 %v158_v32 }
  0x33   : > { %384 = vmatpush3.msra.mxu0 %v142_v33 }
  0x34   : > { %243 = vmatmul.mubr.f32.vlgmr.msra.gmra.mxu0 %v174_v13 }
  0xf4   : > { %v385_v34 = vpop.f32.mrf.mxu0 }
  0xf6   : > { %v386_v35 = vpop.f32.mrf.mxu0 }
  0xf7   : > { %v387_v36 = vadd.f32 %v386_v35, %v385_v34 }
  0xf9   : > { %v248_v37 = vmul.f32 %v387_v36, %v387_v36 }
  0xfb   : > { %v250_v38 = vsel %vm249_vm0, %v248_v37, 0.0 }
  0xfc   : > { %v251_v39 = vrot.slane %v250_v38, 4 }
  0xfe   : > { %v252_v40 = vadd.f32 %v251_v39, %v250_v38 }
 0x100   : > { %v253_v41 = vrot.slane %v252_v40, 2 }
 0x102   : > { %v254_v42 = vadd.f32 %v253_v41, %v252_v40 }
 0x104   : > { %v255_v43 = vrot.slane %v254_v42, 1 }
 0x106   : > { %v256_v44 = vadd.f32 %v255_v43, %v254_v42 }
 0x108   : > { %428 = vrsqrt.f32 %v256_v44  ;;  %vm259_vm1 = vcmp.eq.f32.partialorder %v256_v44, inf  ;;  %v262_v47 = vand.u32 2147483648, %v256_v44  ;;  %vm261_vm2 = vcmp.eq.f32.partialorder %v256_v44, 0.0 }
 0x115   : > { %v429_v45 = vpop.eup %428 }
 0x116   : > { %v258_v46 = vmul.f32 %v429_v45, %v256_v44 }
 0x118   : > { %v260_v48 = vsel %vm259_vm1, %v256_v44, %v258_v46 }
 0x119   : > { %v263_v49 = vsel %vm261_vm2, %v262_v47, %v260_v48 }
 0x11a   : > { %v264_v50 = vmax.f32 %v263_v49, 1e-12 }
 0x11c   : > { %430 = vrcp.f32 %v264_v50 }
 0x129   : > { %v431_v51 = vpop.eup %430 }
 0x12a   : > { %v266_v52 = vmul.f32 %v431_v51, %v387_v36 }
 0x12c   : > { %267 = vst.msk [vmem:[%s136_s8] sm:$0xf] %vm249_vm0, %v266_v52 }
 0x12d   : > { %445 = shalt.err (!%p442_p3)
}
 0x12e   : > { %s446_s26 = scalar_lea.hbm %s280_s21, 64  ;;  %s450_s29 = scalar_lea.hbm %s697_s2, 128 }
 0x12f   : > { %p447_p4 = scmp.ne.s32.totalorder %s280_s21, %s446_s26  ;;  %p451_p9 = scmp.lt.s32.totalorder %s280_s21, %s697_s2 }
 0x130   : > { %p452_p10 = scmp.lt.s32.totalorder %s450_s29, %s446_s26 }
 0x131   : > { %p448_p7 = pnand %p447_p4, %p548_p5 }
 0x132   : > { %p453_p11 = por %p452_p10, %p451_p9 }
 0x133   : > { %p449_p8 = pneg %p448_p7 }
 0x135   : > { %p454_p12 = pnand %p453_p11, %p449_p8 }
 0x137   : > { %457 = shalt.err (!%p454_p12)
}
 0x138   : > { %388 = dma.vmem_to_hbm [thread:$0]  (%p548_p5), %s283_s14, 64, %s280_s21, %s269_s22  }
 0x139 PF: > { %p394_p13 = scmp.ge.s32.totalorder %s492_s12, 2  ;;  %s294_s4 = sand.u32 1, %s480_s9  }
 0x13a   : > { %s295_s5 = scalar_lea.sflag [#allocation3], %s294_s4 }
 0x13b   : > { %p391_p0 = pnand %p394_p13, %p552_p6 }
 0x13d   : > { %p392_p1 = pneg %p391_p0 }
 0x13f   : > { %475 = dma.done.wait (%p392_p1), %s295_s5, 64  }
 0x140   : > { %477 = vsyncadd (%p392_p1), %s295_s5, 4294967232  ;;  %p12_p2 = scmp.ge.s32.totalorder %s535_s15, 4   ;;  %s700_s9 = smov %s484_s10 }
 0x141   : > { %s701_s10 = smov %s488_s11  ;;  %s702_s11 = smov %s546_s18 }
 0x142   : > { %s703_s12 = smov %s535_s15  ;;  %14 = sbr.rel (!%p12_p2) target bundleno = 3 (0x3), region = 63 }
 0x147   :  { %300 = vsyncpa [#allocation3], 1 }
 0x148   :  { %302 = vsyncpa [#allocation3 + $0x1], 1 }

</bundles_post_ra>
